<compile_context>
chip_gen: v5e
topology: v5e:2x2
jax: 0.10.0
libtpu: 0.0.40
codegen_flags: <defaults>
</compile_context>

<pallas_src>
import functools

import jax
import jax.numpy as jnp
from jax.experimental import pallas as pl
from jax.experimental.pallas import tpu as pltpu


def _round_up(x: int, m: int) -> int:
    return pl.cdiv(x, m) * m


def _mlp_kernel(*refs, n_layers: int):
    """Fused MLP body.

    refs = (x_ref, w0_ref, b0_ref, w1_ref, b1_ref, ..., o_ref)
      x_ref : [TB, D0p]   bf16 (VMEM, tiled over batch)
      w_l   : [Dinp, Doutp] bf16 (VMEM, resident across the batch grid)
      b_l   : [1, Doutp]  f32
      o_ref : [TB, DLp]   f32
    """
    x_ref = refs[0]
    o_ref = refs[-1]

    h = x_ref[...]  # bf16 activations for the MXU
    for layer in range(n_layers):
        w = refs[1 + 2 * layer][...]
        b = refs[2 + 2 * layer][...]
        # MXU matmul in bf16 with f32 accumulation, bias broadcast over batch.
        y = jnp.dot(h, w, preferred_element_type=jnp.float32) + b
        if layer < n_layers - 1:
            # Sigmoid in f32 (EUP), back to bf16 for the next MXU pass.
            h = jax.nn.sigmoid(y).astype(jnp.bfloat16)
        else:
            o_ref[...] = y.astype(o_ref.dtype)


def init_mlp_params(key, n_inputs, n_hidden, n_classes):
    """Deterministic init mirroring nn.Linear default: U(-1/sqrt(in), 1/sqrt(in))."""
    dims = [n_inputs] + list(n_hidden) + [n_classes]
    params = []
    for i in range(len(dims) - 1):
        fan_in, fan_out = dims[i], dims[i + 1]
        key, kw, kb = jax.random.split(key, 3)
        bound = 1.0 / jnp.sqrt(jnp.float32(fan_in))
        w = jax.random.uniform(kw, (fan_in, fan_out), jnp.float32, -bound, bound)
        b = jax.random.uniform(kb, (1, fan_out), jnp.float32, -bound, bound)
        params.append((w, b))
    return params


def mlp_forward(x, params, *, batch_tile=256):
    """Fused-MLP forward pass via a single pallas_call.

    x:      [batch, n_inputs] f32
    params: list of (w [in, out] f32, b [1, out] f32)
    returns [batch, n_classes] f32
    """
    batch, n_inputs = x.shape
    n_layers = len(params)
    n_classes = params[-1][0].shape[1]

    # ---- pad shapes: features -> multiple of 128 (lanes), batch -> sublane/tile.
    dims = [n_inputs] + [w.shape[1] for (w, _) in params]
    pdims = [_round_up(d, 128) for d in dims]

    tb = min(batch_tile, _round_up(batch, 8))       # batch tile (multiple of 8)
    bp = _round_up(batch, tb)                       # padded batch

    x_p = jnp.pad(x, ((0, bp - batch), (0, pdims[0] - n_inputs))).astype(jnp.bfloat16)

    padded_params = []
    for layer, (w, b) in enumerate(params):
        din, dout = w.shape
        dinp, doutp = pdims[layer], pdims[layer + 1]
        # Zero padding => padded lanes never leak into real outputs
        # (padded hidden lanes = sigmoid(0), but the next layer's padded weight
        #  rows are zero, so their contribution is exactly 0).
        w_p = jnp.pad(w, ((0, dinp - din), (0, doutp - dout))).astype(jnp.bfloat16)
        b_p = jnp.pad(b, ((0, 0), (0, doutp - dout))).astype(jnp.float32)
        padded_params.append((w_p, b_p))

    # ---- block specs: activations tiled over batch, weights resident in VMEM.
    in_specs = [pl.BlockSpec((tb, pdims[0]), lambda i: (i, 0))]
    flat_inputs = [x_p]
    for (w_p, b_p) in padded_params:
        dinp, doutp = w_p.shape
        in_specs.append(pl.BlockSpec((dinp, doutp), lambda i: (0, 0)))
        in_specs.append(pl.BlockSpec((1, doutp), lambda i: (0, 0)))
        flat_inputs.extend([w_p, b_p])

    out_specs = pl.BlockSpec((tb, pdims[-1]), lambda i: (i, 0))

    kernel = functools.partial(_mlp_kernel, n_layers=n_layers)
    out_p = pl.pallas_call(
        kernel,
        out_shape=jax.ShapeDtypeStruct((bp, pdims[-1]), jnp.float32),
        grid=(bp // tb,),
        in_specs=in_specs,
        out_specs=out_specs,
        compiler_params=pltpu.CompilerParams(
            dimension_semantics=("parallel",),   # shards batch tiles across TCs on v7x
        ),
    )(*flat_inputs)

    # Slice padded batch rows / padded logit lanes back off.
    return out_p[:batch, :n_classes]


def mlp_reference(x, params):
    """Pure-JAX f32 reference."""
    n_layers = len(params)
    out = x
    for i, (w, b) in enumerate(params):
        out = out @ w + b
        if i < n_layers - 1:
            out = jax.nn.sigmoid(out)
    return out


if __name__ == "__main__":
    key = jax.random.PRNGKey(0)
    key, kx = jax.random.split(key)

    # Small shapes consistent with the module: batch=2, n_inputs=32,
    # n_hidden=[64, 32], n_classes=10.
    batch = 2
    n_inputs = 32
    n_hidden = [64, 32]
    n_classes = 10

    x = jax.random.normal(kx, (batch, n_inputs), jnp.float32)
    params = init_mlp_params(key, n_inputs, n_hidden, n_classes)

    fwd = jax.jit(mlp_forward)
    out = jax.block_until_ready(fwd(x, params))

    ref = mlp_reference(x, params)
    assert out.shape == (batch, n_classes)
    # bf16 matmul operands with f32 accumulation -> loosened tolerance.
    assert jnp.allclose(out, ref, atol=2e-2, rtol=2e-2), "Pallas output mismatch vs reference"

    print("KERNEL_OK")
</pallas_src>

<mosaic_0001>
module attributes {stable_mosaic.version = 11 : i64} {
  func.func @_mlp_kernel(%arg0: i32, %arg1: memref<8x128xbf16, #tpu.memory_space<vmem>>, %arg2: memref<128x128xbf16, #tpu.memory_space<vmem>>, %arg3: memref<1x128xf32, #tpu.memory_space<vmem>>, %arg4: memref<128x128xbf16, #tpu.memory_space<vmem>>, %arg5: memref<1x128xf32, #tpu.memory_space<vmem>>, %arg6: memref<128x128xbf16, #tpu.memory_space<vmem>>, %arg7: memref<1x128xf32, #tpu.memory_space<vmem>>, %arg8: memref<8x128xf32, #tpu.memory_space<vmem>>) attributes {dimension_semantics = [#tpu.dimension_semantics<parallel>], iteration_bounds = array<i64: 1>, scalar_prefetch = 0 : i64, scratch_operands = 0 : i64, tpu.core_type = #tpu.core_type<tc>, window_params = [{transform_indices = @transform_0, window_bounds = array<i64: 8, 128>}, {pipeline_mode = #tpu.pipeline_mode<synchronous>, transform_indices = @transform_1, window_bounds = array<i64: 128, 128>}, {pipeline_mode = #tpu.pipeline_mode<synchronous>, transform_indices = @transform_2, window_bounds = array<i64: 1, 128>}, {pipeline_mode = #tpu.pipeline_mode<synchronous>, transform_indices = @transform_3, window_bounds = array<i64: 128, 128>}, {pipeline_mode = #tpu.pipeline_mode<synchronous>, transform_indices = @transform_4, window_bounds = array<i64: 1, 128>}, {pipeline_mode = #tpu.pipeline_mode<synchronous>, transform_indices = @transform_5, window_bounds = array<i64: 128, 128>}, {pipeline_mode = #tpu.pipeline_mode<synchronous>, transform_indices = @transform_6, window_bounds = array<i64: 1, 128>}, {transform_indices = @transform_7, window_bounds = array<i64: 8, 128>}]} {
    %c0 = arith.constant 0 : index
    %c0_0 = arith.constant 0 : index
    %0 = vector.load %arg1[%c0, %c0_0] : memref<8x128xbf16, #tpu.memory_space<vmem>>, vector<8x128xbf16>
    %c0_1 = arith.constant 0 : index
    %c0_2 = arith.constant 0 : index
    %1 = vector.load %arg2[%c0_1, %c0_2] : memref<128x128xbf16, #tpu.memory_space<vmem>>, vector<128x128xbf16>
    %c0_3 = arith.constant 0 : index
    %c0_4 = arith.constant 0 : index
    %2 = vector.load %arg3[%c0_3, %c0_4] : memref<1x128xf32, #tpu.memory_space<vmem>>, vector<1x128xf32>
    %cst = arith.constant dense<0.000000e+00> : vector<8x128xf32>
    %3 = tpu.matmul %0, %1, %cst {dimension_numbers = #tpu.dot_dimension_numbers<[1], [0], [0], [1], [0, 0, 1, 1], [], []>} : vector<8x128xbf16>, vector<128x128xbf16>, vector<8x128xf32> -> vector<8x128xf32>
    %4 = vector.broadcast %2 : vector<1x128xf32> to vector<8x128xf32>
    %5 = arith.addf %3, %4 : vector<8x128xf32>
    %6 = arith.negf %5 : vector<8x128xf32>
    %7 = math.exp %6 : vector<8x128xf32>
    %cst_5 = arith.constant 1.000000e+00 : f32
    %8 = vector.broadcast %cst_5 : f32 to vector<8x128xf32>
    %9 = arith.addf %8, %7 : vector<8x128xf32>
    %10 = arith.divf %8, %9 : vector<8x128xf32>
    %11 = arith.truncf %10 : vector<8x128xf32> to vector<8x128xbf16>
    %c0_6 = arith.constant 0 : index
    %c0_7 = arith.constant 0 : index
    %12 = vector.load %arg4[%c0_6, %c0_7] : memref<128x128xbf16, #tpu.memory_space<vmem>>, vector<128x128xbf16>
    %c0_8 = arith.constant 0 : index
    %c0_9 = arith.constant 0 : index
    %13 = vector.load %arg5[%c0_8, %c0_9] : memref<1x128xf32, #tpu.memory_space<vmem>>, vector<1x128xf32>
    %cst_10 = arith.constant dense<0.000000e+00> : vector<8x128xf32>
    %14 = tpu.matmul %11, %12, %cst_10 {dimension_numbers = #tpu.dot_dimension_numbers<[1], [0], [0], [1], [0, 0, 1, 1], [], []>} : vector<8x128xbf16>, vector<128x128xbf16>, vector<8x128xf32> -> vector<8x128xf32>
    %15 = vector.broadcast %13 : vector<1x128xf32> to vector<8x128xf32>
    %16 = arith.addf %14, %15 : vector<8x128xf32>
    %17 = arith.negf %16 : vector<8x128xf32>
    %18 = math.exp %17 : vector<8x128xf32>
    %cst_11 = arith.constant 1.000000e+00 : f32
    %19 = vector.broadcast %cst_11 : f32 to vector<8x128xf32>
    %20 = arith.addf %19, %18 : vector<8x128xf32>
    %21 = arith.divf %19, %20 : vector<8x128xf32>
    %22 = arith.truncf %21 : vector<8x128xf32> to vector<8x128xbf16>
    %c0_12 = arith.constant 0 : index
    %c0_13 = arith.constant 0 : index
    %23 = vector.load %arg6[%c0_12, %c0_13] : memref<128x128xbf16, #tpu.memory_space<vmem>>, vector<128x128xbf16>
    %c0_14 = arith.constant 0 : index
    %c0_15 = arith.constant 0 : index
    %24 = vector.load %arg7[%c0_14, %c0_15] : memref<1x128xf32, #tpu.memory_space<vmem>>, vector<1x128xf32>
    %cst_16 = arith.constant dense<0.000000e+00> : vector<8x128xf32>
    %25 = tpu.matmul %22, %23, %cst_16 {dimension_numbers = #tpu.dot_dimension_numbers<[1], [0], [0], [1], [0, 0, 1, 1], [], []>} : vector<8x128xbf16>, vector<128x128xbf16>, vector<8x128xf32> -> vector<8x128xf32>
    %26 = vector.broadcast %24 : vector<1x128xf32> to vector<8x128xf32>
    %27 = arith.addf %25, %26 : vector<8x128xf32>
    %c0_17 = arith.constant 0 : index
    %c0_18 = arith.constant 0 : index
    %28 = vector.load %arg8[%c0_17, %c0_18] : memref<8x128xf32, #tpu.memory_space<vmem>>, vector<8x128xf32>
    tpu.vector_store %arg8[%c0_17, %c0_18], %27 {strides = array<i32>} : memref<8x128xf32, #tpu.memory_space<vmem>>, vector<8x128xf32>,
    return
  }
  func.func @transform_0(%arg0: i32) -> (i32, i32) {
    %c0_i32 = arith.constant 0 : i32
    %c0_i32_0 = arith.constant 0 : i32
    return %arg0, %c0_i32 : i32, i32
  }
  func.func @transform_1(%arg0: i32) -> (i32, i32) {
    %c0_i32 = arith.constant 0 : i32
    %c0_i32_0 = arith.constant 0 : i32
    %c0_i32_1 = arith.constant 0 : i32
    return %c0_i32, %c0_i32_0 : i32, i32
  }
  func.func @transform_2(%arg0: i32) -> (i32, i32) {
    %c0_i32 = arith.constant 0 : i32
    %c0_i32_0 = arith.constant 0 : i32
    %c0_i32_1 = arith.constant 0 : i32
    return %c0_i32, %c0_i32_0 : i32, i32
  }
  func.func @transform_3(%arg0: i32) -> (i32, i32) {
    %c0_i32 = arith.constant 0 : i32
    %c0_i32_0 = arith.constant 0 : i32
    %c0_i32_1 = arith.constant 0 : i32
    return %c0_i32, %c0_i32_0 : i32, i32
  }
  func.func @transform_4(%arg0: i32) -> (i32, i32) {
    %c0_i32 = arith.constant 0 : i32
    %c0_i32_0 = arith.constant 0 : i32
    %c0_i32_1 = arith.constant 0 : i32
    return %c0_i32, %c0_i32_0 : i32, i32
  }
  func.func @transform_5(%arg0: i32) -> (i32, i32) {
    %c0_i32 = arith.constant 0 : i32
    %c0_i32_0 = arith.constant 0 : i32
    %c0_i32_1 = arith.constant 0 : i32
    return %c0_i32, %c0_i32_0 : i32, i32
  }
  func.func @transform_6(%arg0: i32) -> (i32, i32) {
    %c0_i32 = arith.constant 0 : i32
    %c0_i32_0 = arith.constant 0 : i32
    %c0_i32_1 = arith.constant 0 : i32
    return %c0_i32, %c0_i32_0 : i32, i32
  }
  func.func @transform_7(%arg0: i32) -> (i32, i32) {
    %c0_i32 = arith.constant 0 : i32
    %c0_i32_0 = arith.constant 0 : i32
    return %arg0, %c0_i32 : i32, i32
  }
}

</mosaic_0001>

<bundles_post_ra>
// kernel: mlp_forward.1
= control target key start
LH: loop header
LB: loop body
LE: loop exit
PB: predicated region body
PF: predicated region fallthrough
CT: control target
= control target key end

     0   :  { %s575_s1 = inlined_call_operand.vmem [shape: bf16[128,128], index: 1, kind: input, shape index: {}]   ;;  %s576_s2 = inlined_call_operand.vmem [shape: f32[1,128], index: 2, kind: input, shape index: {}]   ;;  %s577_s0 = inlined_call_operand.vmem [shape: bf16[8,128], index: 0, kind: input, shape index: {}]   ;;  %s578_s4 = inlined_call_operand.vmem [shape: f32[1,128], index: 4, kind: input, shape index: {}]   ;;  %s579_s3 = inlined_call_operand.vmem [shape: bf16[128,128], index: 3, kind: input, shape index: {}]   ;;  %s580_s6 = inlined_call_operand.vmem [shape: f32[1,128], index: 6, kind: input, shape index: {}]   ;;  %s581_s5 = inlined_call_operand.vmem [shape: bf16[128,128], index: 5, kind: input, shape index: {}]   ;;  %s582_s7 = inlined_call_operand.vmem [shape: f32[8,128], index: 7, kind: output, shape index: {}]  }
   0x1   :  { %v420_v0 = vld [vmem:[%s575_s1 + $0x38] sm:$0xff]  ;;  %v419_v1 = vld [vmem:[%s575_s1 + $0x30] sm:$0xff]  ;;  %v418_v2 = vld [vmem:[%s575_s1 + $0x28] sm:$0xff] }
   0x2   :  { %95 = vmatpush.bf16.msra.mxu0 %v420_v0  ;;  %v417_v3 = vld [vmem:[%s575_s1 + $0x20] sm:$0xff]  ;;  %v416_v4 = vld [vmem:[%s575_s1 + $0x18] sm:$0xff]  ;;  %v415_v5 = vld [vmem:[%s575_s1 + $0x10] sm:$0xff] }
   0x3   :  { %v414_v6 = vld [vmem:[%s575_s1 + $0x8] sm:$0xff]  ;;  %v413_v7 = vld [vmem:[%s575_s1] sm:$0xff]  ;;  %v428_v9 = vld [vmem:[%s579_s3 + $0x38] sm:$0xff] }
   0x4   :  { %v26_v8 = vld [vmem:[%s577_s0] sm:$0xf]  ;;  %196 = vmatpush.bf16.msra.mxu1 %v428_v9  ;;  %v427_v10 = vld [vmem:[%s579_s3 + $0x30] sm:$0xff]  ;;  %v426_v11 = vld [vmem:[%s579_s3 + $0x28] sm:$0xff] }
   0x5   :  { %v425_v12 = vld [vmem:[%s579_s3 + $0x20] sm:$0xff]  ;;  %v424_v13 = vld [vmem:[%s579_s3 + $0x18] sm:$0xff]  ;;  %v423_v14 = vld [vmem:[%s579_s3 + $0x10] sm:$0xff] }
   0x6   :  { %96 = vmatpush.bf16.msra.mxu0 %v419_v1  ;;  %v422_v15 = vld [vmem:[%s579_s3 + $0x8] sm:$0xff]  ;;  %v421_v16 = vld [vmem:[%s579_s3] sm:$0xff]  ;;  %v436_v35 = vld [vmem:[%s581_s5 + $0x38] sm:$0xff] }
   0x7   :  { %v437_v17 = vld [vmem:[%s576_s2] ss:$0 sm:$0xff]  ;;  %297 = vmatpush.bf16.msra.mxu2 %v436_v35  ;;  %v435_v36 = vld [vmem:[%s581_s5 + $0x30] sm:$0xff]  ;;  %v434_v37 = vld [vmem:[%s581_s5 + $0x28] sm:$0xff] }
   0x8   :  { %197 = vmatpush.bf16.msra.mxu1 %v427_v10  ;;  %v433_v38 = vld [vmem:[%s581_s5 + $0x20] sm:$0xff]  ;;  %v432_v39 = vld [vmem:[%s581_s5 + $0x18] sm:$0xff]  ;;  %v431_v40 = vld [vmem:[%s581_s5 + $0x10] sm:$0xff] }
   0x9   :  { %v430_v41 = vld [vmem:[%s581_s5 + $0x8] sm:$0xff]  ;;  %v429_v42 = vld [vmem:[%s581_s5] sm:$0xff] }
   0xa   :  { %97 = vmatpush.bf16.msra.mxu0 %v418_v2  ;;  %v438_v43 = vld [vmem:[%s578_s4] ss:$0 sm:$0xff] }
   0xb   :  { %298 = vmatpush.bf16.msra.mxu2 %v435_v36  ;;  %v439_v61 = vld [vmem:[%s580_s6] ss:$0 sm:$0xff] }
   0xc   :  { %198 = vmatpush.bf16.msra.mxu1 %v426_v11 }
   0xe   :  { %98 = vmatpush.bf16.msra.mxu0 %v417_v3 }
   0xf   :  { %299 = vmatpush.bf16.msra.mxu2 %v434_v37 }
  0x10   :  { %199 = vmatpush.bf16.msra.mxu1 %v425_v12 }
  0x12   :  { %99 = vmatpush.bf16.msra.mxu0 %v416_v4 }
  0x13   :  { %300 = vmatpush.bf16.msra.mxu2 %v433_v38 }
  0x14   :  { %200 = vmatpush.bf16.msra.mxu1 %v424_v13 }
  0x16   :  { %100 = vmatpush.bf16.msra.mxu0 %v415_v5 }
  0x17   :  { %301 = vmatpush.bf16.msra.mxu2 %v432_v39 }
  0x18   :  { %201 = vmatpush.bf16.msra.mxu1 %v423_v14 }
  0x1a   :  { %101 = vmatpush.bf16.msra.mxu0 %v414_v6 }
  0x1b   :  { %302 = vmatpush.bf16.msra.mxu2 %v431_v40 }
  0x1c   :  { %202 = vmatpush.bf16.msra.mxu1 %v422_v15 }
  0x1e   :  { %102 = vmatpush.bf16.msra.mxu0 %v413_v7 }
  0x1f   :  { %303 = vmatpush.bf16.msra.mxu2 %v430_v41 }
  0x20   :  { %203 = vmatpush.bf16.msra.mxu1 %v421_v16 }
  0x21   :  { %103 = vmatmul.bf16.vlgmr.msra.gmra.mxu0 %v26_v8 }
  0x23   :  { %304 = vmatpush.bf16.msra.mxu2 %v429_v42 }
  0x9e   :  { %v104_v18 = vpop.f32.mrf.mxu0 }
  0x9f   :  { %v105_v19 = vadd.f32 %v437_v17, %v104_v18 }
  0xa1   :  { %v347_v20 = vmul.f32 -1.442695, %v105_v19 }
  0xa3   :  { %440 = vpow2.f32 %v347_v20 }
  0xa6   :  { %v106_v21 = vpop.f32.mrf.mxu0 }
  0xa9   :  { %v441_v22 = vpop.eup %440 }
  0xaa   :  { %v111_v23 = vadd.f32 1.0, %v441_v22 }
  0xac   :  { %442 = vrcp.f32 %v111_v23  ;;  %v123_v27 = vand.u32 2147483648, %v111_v23  ;;  %v121_v29 = vand.u32 2147483647, %v111_v23  ;;  %vm117_vm1 = vweird.f32 %v111_v23 }
  0xae   :  { %v124_v31 = vor.u32 1.1754944e-38, %v123_v27  ;;  %vm122_vm3 = vcmp.eq.f32.partialorder %v121_v29, 8.507059e+37 }
  0xb2   :  { %v443_v24 = vpop.eup %442 }
  0xb3   :  { %v113_v25 = vmul.f32 %v443_v24, %v111_v23  ;;  %vm118_vm0 = vweird.f32 %v443_v24 }
  0xb4   :  { %vm119_vm2 = vmor %vm117_vm1, %vm118_vm0 }
  0xb5   :  { %v114_v26 = vsub.f32 1.0, %v113_v25 }
  0xb7   :  { %v115_v28 = vmul.f32 %v443_v24, %v114_v26 }
  0xb9   :  { %v116_v30 = vadd.f32 %v443_v24, %v115_v28 }
  0xbb   :  { %v120_v32 = vsel %vm119_vm2, %v443_v24, %v116_v30 }
  0xbc   :  { %v125_v33 = vsel %vm122_vm3, %v124_v31, %v120_v32 }
  0xbd   :  { %v127_v34 = vpack.c.bf16 %v125_v33, %v125_v33 }
  0xbf   :  { %204 = vmatmul.bf16.vlgmr.msra.gmra.mxu1 %v127_v34 }
 0x13c   :  { %v205_v44 = vpop.f32.mrf.mxu1 }
 0x13d   :  { %v206_v45 = vadd.f32 %v438_v43, %v205_v44 }
 0x13f   :  { %v380_v46 = vmul.f32 -1.442695, %v206_v45 }
 0x141   :  { %444 = vpow2.f32 %v380_v46 }
 0x144   :  { %v207_v47 = vpop.f32.mrf.mxu1 }
 0x147   :  { %v445_v48 = vpop.eup %444 }
 0x148   :  { %v212_v49 = vadd.f32 1.0, %v445_v48 }
 0x14a   :  { %446 = vrcp.f32 %v212_v49  ;;  %v224_v53 = vand.u32 2147483648, %v212_v49  ;;  %v222_v55 = vand.u32 2147483647, %v212_v49  ;;  %vm218_vm5 = vweird.f32 %v212_v49 }
 0x14c   :  { %v225_v57 = vor.u32 1.1754944e-38, %v224_v53  ;;  %vm223_vm7 = vcmp.eq.f32.partialorder %v222_v55, 8.507059e+37 }
 0x150   :  { %v447_v50 = vpop.eup %446 }
 0x151   :  { %v214_v51 = vmul.f32 %v447_v50, %v212_v49  ;;  %vm219_vm4 = vweird.f32 %v447_v50 }
 0x152   :  { %vm220_vm6 = vmor %vm218_vm5, %vm219_vm4 }
 0x153   :  { %v215_v52 = vsub.f32 1.0, %v214_v51 }
 0x155   :  { %v216_v54 = vmul.f32 %v447_v50, %v215_v52 }
 0x157   :  { %v217_v56 = vadd.f32 %v447_v50, %v216_v54 }
 0x159   :  { %v221_v58 = vsel %vm220_vm6, %v447_v50, %v217_v56 }
 0x15a   :  { %v226_v59 = vsel %vm223_vm7, %v225_v57, %v221_v58 }
 0x15b   :  { %v228_v60 = vpack.c.bf16 %v226_v59, %v226_v59 }
 0x15d   :  { %305 = vmatmul.bf16.vlgmr.msra.gmra.mxu2 %v228_v60 }
 0x1e0   :  { %v306_v62 = vpop.f32.mrf.mxu2 }
 0x1e1   :  { %v307_v63 = vadd.f32 %v439_v61, %v306_v62 }
 0x1e3   :  { %310 = vst [vmem:[%s582_s7] sm:$0xff] %v307_v63 }
 0x1e8   :  { %v308_v0 = vpop.f32.mrf.mxu2 }

</bundles_post_ra>
